<compile_context>
chip_gen: v5e
topology: v5e:2x2
jax: 0.10.0
libtpu: 0.0.40
codegen_flags: <defaults>
</compile_context>

<pallas_src>
import functools

import numpy as np
import jax
import jax.numpy as jnp
from jax.experimental import pallas as pl
from jax.experimental.pallas import tpu as pltpu

LANE = 128
SUBLANE = 8
MAX_TB = 512          # batch-tile cap (rows)


def _round_up(x, m):
    return (x + m - 1) // m * m


# ---------------------------------------------------------------------------
# Fused policy kernel: x -> [Linear+ReLU]*n -> mean head -> (mean[, sample])
# ---------------------------------------------------------------------------
def _policy_kernel(*refs, n_hidden, stochastic):
    # stochastic refs: x, (w0,b0)..(w_{n-1},b_{n-1}), w_mean, b_mean, std,
    #                  noise, mean_out, sample_out
    # determin. refs: x, (w0,b0)..(w_{n-1},b_{n-1}), w_mean, b_mean, mean_out
    h = refs[0][...]                                   # bf16 activations
    idx = 1
    for _ in range(n_hidden):
        w_ref, b_ref = refs[idx], refs[idx + 1]
        idx += 2
        acc = jnp.dot(h, w_ref[...], preferred_element_type=jnp.float32)
        acc = acc + b_ref[...]                         # f32 bias add
        h = jnp.maximum(acc, 0.0).astype(jnp.bfloat16)  # f32 ReLU -> bf16
    wm_ref, bm_ref = refs[idx], refs[idx + 1]
    idx += 2
    mean = jnp.dot(h, wm_ref[...], preferred_element_type=jnp.float32) + bm_ref[...]
    if stochastic:
        std_ref, nz_ref, mean_out, samp_out = refs[idx:idx + 4]
        mean_out[...] = mean.astype(mean_out.dtype)
        samp_out[...] = (mean + nz_ref[...] * std_ref[...]).astype(samp_out.dtype)
    else:
        mean_out = refs[idx]
        mean_out[...] = mean.astype(mean_out.dtype)


# ---------------------------------------------------------------------------
# One-time parameter preparation (transpose + pad + bf16 cast + exp(log_std))
# ---------------------------------------------------------------------------
def prepare_params(raw, num_features, hidden_sizes, action_dim):
    in_dims = [num_features] + list(hidden_sizes)
    out_dims = list(hidden_sizes) + [action_dim]
    w_raw = [raw[f"w{i}"] for i in range(len(hidden_sizes))] + [raw["w_mean"]]
    b_raw = [raw[f"b{i}"] for i in range(len(hidden_sizes))] + [raw["b_mean"]]

    ws, bs = [], []
    for W, b, din, dout in zip(w_raw, b_raw, in_dims, out_dims):
        din_p, dout_p = _round_up(din, LANE), _round_up(dout, LANE)
        Wt = jnp.zeros((din_p, dout_p), jnp.bfloat16).at[:din, :dout].set(
            jnp.asarray(W).T.astype(jnp.bfloat16))
        bp = jnp.zeros((1, dout_p), jnp.float32).at[:, :dout].set(
            jnp.asarray(b, jnp.float32))
        ws.append(Wt)
        bs.append(bp)

    a_pad = _round_up(action_dim, LANE)
    std = jnp.zeros((1, a_pad), jnp.float32).at[:, :action_dim].set(
        jnp.exp(jnp.asarray(raw["log_std"], jnp.float32)))
    return {"w": tuple(ws), "b": tuple(bs), "std": std,
            "num_features": num_features, "action_dim": action_dim}


# ---------------------------------------------------------------------------
# Jitted forward implementation (padding fused with the pallas_call)
# ---------------------------------------------------------------------------
@functools.partial(jax.jit,
                   static_argnames=("deterministic", "out_dtype", "action_dim"))
def _forward_impl(x, noise, ws, bs, std, *, deterministic, out_dtype, action_dim):
    B, F = x.shape
    n_hidden = len(ws) - 1
    F_pad = ws[0].shape[0]
    A_pad = ws[-1].shape[1]

    TB = min(MAX_TB, _round_up(B, SUBLANE))      # batch tile
    B_pad = _round_up(B, TB)
    grid = (B_pad // TB,)

    # Padding happens inside this jit -> same XLA program as the kernel.
    x_pad = jnp.zeros((B_pad, F_pad), jnp.bfloat16).at[:B, :F].set(
        x.astype(jnp.bfloat16))

    def full_spec(arr):
        return pl.BlockSpec(arr.shape, lambda i: (0, 0))

    inputs = [x_pad]
    in_specs = [pl.BlockSpec((TB, F_pad), lambda i: (i, 0))]
    for w, b in zip(ws[:-1], bs[:-1]):
        inputs += [w, b]
        in_specs += [full_spec(w), full_spec(b)]
    inputs += [ws[-1], bs[-1]]
    in_specs += [full_spec(ws[-1]), full_spec(bs[-1])]

    out_itemsize = np.dtype(out_dtype).itemsize
    if deterministic:
        out_shape = jax.ShapeDtypeStruct((B_pad, A_pad), out_dtype)
        out_specs = pl.BlockSpec((TB, A_pad), lambda i: (i, 0))
        n_out = 1
        noise_bytes = 0
    else:
        noise_pad = jnp.zeros((B_pad, A_pad), jnp.float32).at[
            :B, :action_dim].set(noise.astype(jnp.float32))
        inputs += [std, noise_pad]
        in_specs += [full_spec(std), pl.BlockSpec((TB, A_pad), lambda i: (i, 0))]
        out_shape = (jax.ShapeDtypeStruct((B_pad, A_pad), out_dtype),
                     jax.ShapeDtypeStruct((B_pad, A_pad), out_dtype))
        out_specs = (pl.BlockSpec((TB, A_pad), lambda i: (i, 0)),
                     pl.BlockSpec((TB, A_pad), lambda i: (i, 0)))
        n_out = 2
        noise_bytes = TB * A_pad * 4

    # Size the scoped-VMEM limit from the actual working set (+headroom),
    # clamped so it stays valid on v7x (64 MiB physical VMEM per TC).
    param_bytes = (sum(int(np.prod(w.shape)) * 2 for w in ws)
                   + sum(int(np.prod(b.shape)) * 4 for b in bs)
                   + int(np.prod(std.shape)) * 4)
    stream_bytes = TB * F_pad * 2 + noise_bytes + n_out * TB * A_pad * out_itemsize
    act_bytes = 4 * TB * max(int(w.shape[1]) for w in ws) * 4
    vmem_limit = int(min(64 * 1024 * 1024,
                         max(8 * 1024 * 1024,
                             2 * (2 * param_bytes + 2 * stream_bytes + act_bytes))))

    result = pl.pallas_call(
        functools.partial(_policy_kernel, n_hidden=n_hidden,
                          stochastic=not deterministic),
        grid=grid,
        out_shape=out_shape,
        in_specs=in_specs,
        out_specs=out_specs,
        compiler_params=pltpu.CompilerParams(
            dimension_semantics=("parallel",),
            vmem_limit_bytes=vmem_limit),
    )(*inputs)

    if deterministic:
        mean_p = result
        mean_sl = mean_p[:B, :action_dim]
        return mean_sl, mean_sl
    mean_p, samp_p = result
    return mean_p[:B, :action_dim], samp_p[:B, :action_dim]


# ---------------------------------------------------------------------------
# Public forward pass (mirrors GaussianPolicy.forward -> (mean, output))
# ---------------------------------------------------------------------------
def gaussian_policy_forward(x, prepped, noise=None, key=None,
                            deterministic=False, out_dtype=jnp.float32):
    x = jnp.asarray(x)
    squeeze = False
    if x.ndim == 1:                      # predict(): unsqueeze(0)
        x = x[None]
        squeeze = True
    B, F = x.shape
    assert F == prepped["num_features"]
    action_dim = prepped["action_dim"]

    if deterministic:
        noise_arg = None
    else:
        if noise is None:                # mirror torch.randn via reparameterization
            if key is None:
                key = jax.random.PRNGKey(0)
            noise = jax.random.normal(key, (B, action_dim), jnp.float32)
        noise_arg = jnp.asarray(noise, jnp.float32).reshape(B, action_dim)

    mean, out = _forward_impl(x, noise_arg, prepped["w"], prepped["b"],
                              prepped["std"], deterministic=deterministic,
                              out_dtype=out_dtype, action_dim=action_dim)
    if squeeze:
        return mean[0], out[0]
    return mean, out


# ---------------------------------------------------------------------------
# Deterministic parameter init (xavier_uniform weights, torch-default biases)
# ---------------------------------------------------------------------------
def _xavier_uniform(key, fan_out, fan_in):
    bound = float(np.sqrt(6.0 / (fan_in + fan_out)))
    return jax.random.uniform(key, (fan_out, fan_in), jnp.float32, -bound, bound)


def init_params(seed, num_features, hidden_sizes, action_dim, log_std_init=-0.5):
    dims = [num_features] + list(hidden_sizes)
    n = len(hidden_sizes)
    keys = jax.random.split(jax.random.PRNGKey(seed), 2 * (n + 1))
    raw = {}
    for i in range(n):
        fi, fo = dims[i], dims[i + 1]
        raw[f"w{i}"] = _xavier_uniform(keys[2 * i], fo, fi)
        raw[f"b{i}"] = jax.random.uniform(keys[2 * i + 1], (fo,), jnp.float32,
                                          -1.0 / np.sqrt(fi), 1.0 / np.sqrt(fi))
    raw["w_mean"] = _xavier_uniform(keys[2 * n], action_dim, hidden_sizes[-1])
    raw["b_mean"] = jax.random.uniform(keys[2 * n + 1], (action_dim,), jnp.float32,
                                       -1.0 / np.sqrt(hidden_sizes[-1]),
                                       1.0 / np.sqrt(hidden_sizes[-1]))
    raw["log_std"] = jnp.full((action_dim,), log_std_init, jnp.float32)
    return raw


# ---------------------------------------------------------------------------
# Pure-JAX references (f32 and bf16-simulating) for in-script checks
# ---------------------------------------------------------------------------
def reference_forward_f32(x, raw, hidden_sizes, noise=None, deterministic=False):
    h = jnp.asarray(x, jnp.float32)
    for i in range(len(hidden_sizes)):
        h = jax.nn.relu(h @ raw[f"w{i}"].T + raw[f"b{i}"])
    mean = h @ raw["w_mean"].T + raw["b_mean"]
    out = mean if (deterministic or noise is None) else mean + noise * jnp.exp(raw["log_std"])
    return mean, out


def reference_forward_bf16(x, raw, hidden_sizes, noise=None, deterministic=False):
    h = jnp.asarray(x).astype(jnp.bfloat16)
    for i in range(len(hidden_sizes)):
        W = raw[f"w{i}"].T.astype(jnp.bfloat16)
        acc = jnp.dot(h, W, preferred_element_type=jnp.float32) + raw[f"b{i}"]
        h = jnp.maximum(acc, 0.0).astype(jnp.bfloat16)
    Wm = raw["w_mean"].T.astype(jnp.bfloat16)
    mean = jnp.dot(h, Wm, preferred_element_type=jnp.float32) + raw["b_mean"]
    out = mean if (deterministic or noise is None) else mean + noise * jnp.exp(raw["log_std"])
    return mean, out


if __name__ == "__main__":
    num_features, hidden_sizes, action_dim = 32, (64, 64), 6
    B = 4

    raw = init_params(0, num_features, hidden_sizes, action_dim, log_std_init=-0.5)
    prepped = prepare_params(raw, num_features, hidden_sizes, action_dim)

    key = jax.random.PRNGKey(0)
    kx, kn = jax.random.split(key)
    x = jax.random.normal(kx, (B, num_features), jnp.float32)
    noise = jax.random.normal(kn, (B, action_dim), jnp.float32)

    # --- stochastic path (same external noise fed to kernel and references) ---
    mean_k, out_k = gaussian_policy_forward(x, prepped, noise=noise)
    mean_k, out_k = jax.block_until_ready(mean_k), jax.block_until_ready(out_k)
    assert mean_k.shape == (B, action_dim) and out_k.shape == (B, action_dim)

    mean_rb, out_rb = reference_forward_bf16(x, raw, hidden_sizes, noise=noise)
    np.testing.assert_allclose(np.asarray(mean_k), np.asarray(mean_rb),
                               rtol=5e-3, atol=5e-3)
    np.testing.assert_allclose(np.asarray(out_k), np.asarray(out_rb),
                               rtol=5e-3, atol=5e-3)

    mean_rf, out_rf = reference_forward_f32(x, raw, hidden_sizes, noise=noise)
    np.testing.assert_allclose(np.asarray(mean_k), np.asarray(mean_rf),
                               rtol=5e-2, atol=5e-2)
    np.testing.assert_allclose(np.asarray(out_k), np.asarray(out_rf),
                               rtol=5e-2, atol=5e-2)

    # --- deterministic fast path: single output stream, output == mean ---
    mean_d, out_d = gaussian_policy_forward(x, prepped, deterministic=True)
    mean_d, out_d = jax.block_until_ready(mean_d), jax.block_until_ready(out_d)
    np.testing.assert_allclose(np.asarray(out_d), np.asarray(mean_d),
                               rtol=0.0, atol=0.0)
    np.testing.assert_allclose(np.asarray(mean_d), np.asarray(mean_rb),
                               rtol=5e-3, atol=5e-3)

    # --- predict()-style 1-D input ---
    mean_1, out_1 = gaussian_policy_forward(x[0], prepped, noise=noise[0])
    jax.block_until_ready(out_1)
    assert mean_1.shape == (action_dim,) and out_1.shape == (action_dim,)
    np.testing.assert_allclose(np.asarray(mean_1), np.asarray(mean_k[0]),
                               rtol=5e-3, atol=5e-3)

    # --- bf16 output path (serving dtype) ---
    mean_b, out_b = gaussian_policy_forward(x, prepped, noise=noise,
                                            out_dtype=jnp.bfloat16)
    mean_b, out_b = jax.block_until_ready(mean_b), jax.block_until_ready(out_b)
    assert mean_b.dtype == jnp.bfloat16 and out_b.dtype == jnp.bfloat16
    np.testing.assert_allclose(np.asarray(mean_b, np.float32),
                               np.asarray(mean_rb), rtol=5e-2, atol=5e-2)

    print("KERNEL_OK")
</pallas_src>

<mosaic_0001>
module attributes {stable_mosaic.version = 11 : i64} {
  func.func @_policy_kernel(%arg0: i32, %arg1: memref<8x128xbf16, #tpu.memory_space<vmem>>, %arg2: memref<128x128xbf16, #tpu.memory_space<vmem>>, %arg3: memref<1x128xf32, #tpu.memory_space<vmem>>, %arg4: memref<128x128xbf16, #tpu.memory_space<vmem>>, %arg5: memref<1x128xf32, #tpu.memory_space<vmem>>, %arg6: memref<128x128xbf16, #tpu.memory_space<vmem>>, %arg7: memref<1x128xf32, #tpu.memory_space<vmem>>, %arg8: memref<1x128xf32, #tpu.memory_space<vmem>>, %arg9: memref<8x128xf32, #tpu.memory_space<vmem>>, %arg10: memref<8x128xf32, #tpu.memory_space<vmem>>, %arg11: memref<8x128xf32, #tpu.memory_space<vmem>>) attributes {dimension_semantics = [#tpu.dimension_semantics<parallel>], iteration_bounds = array<i64: 1>, scalar_prefetch = 0 : i64, scratch_operands = 0 : i64, tpu.core_type = #tpu.core_type<tc>, window_params = [{transform_indices = @transform_0, window_bounds = array<i64: 8, 128>}, {pipeline_mode = #tpu.pipeline_mode<synchronous>, transform_indices = @transform_1, window_bounds = array<i64: 128, 128>}, {pipeline_mode = #tpu.pipeline_mode<synchronous>, transform_indices = @transform_2, window_bounds = array<i64: 1, 128>}, {pipeline_mode = #tpu.pipeline_mode<synchronous>, transform_indices = @transform_3, window_bounds = array<i64: 128, 128>}, {pipeline_mode = #tpu.pipeline_mode<synchronous>, transform_indices = @transform_4, window_bounds = array<i64: 1, 128>}, {pipeline_mode = #tpu.pipeline_mode<synchronous>, transform_indices = @transform_5, window_bounds = array<i64: 128, 128>}, {pipeline_mode = #tpu.pipeline_mode<synchronous>, transform_indices = @transform_6, window_bounds = array<i64: 1, 128>}, {pipeline_mode = #tpu.pipeline_mode<synchronous>, transform_indices = @transform_7, window_bounds = array<i64: 1, 128>}, {transform_indices = @transform_8, window_bounds = array<i64: 8, 128>}, {transform_indices = @transform_9, window_bounds = array<i64: 8, 128>}, {transform_indices = @transform_10, window_bounds = array<i64: 8, 128>}]} {
    %c0 = arith.constant 0 : index
    %c0_0 = arith.constant 0 : index
    %0 = vector.load %arg1[%c0, %c0_0] : memref<8x128xbf16, #tpu.memory_space<vmem>>, vector<8x128xbf16>
    %c0_1 = arith.constant 0 : index
    %c0_2 = arith.constant 0 : index
    %1 = vector.load %arg2[%c0_1, %c0_2] : memref<128x128xbf16, #tpu.memory_space<vmem>>, vector<128x128xbf16>
    %cst = arith.constant dense<0.000000e+00> : vector<8x128xf32>
    %2 = tpu.matmul %0, %1, %cst {dimension_numbers = #tpu.dot_dimension_numbers<[1], [0], [0], [1], [0, 0, 1, 1], [], []>} : vector<8x128xbf16>, vector<128x128xbf16>, vector<8x128xf32> -> vector<8x128xf32>
    %c0_3 = arith.constant 0 : index
    %c0_4 = arith.constant 0 : index
    %3 = vector.load %arg3[%c0_3, %c0_4] : memref<1x128xf32, #tpu.memory_space<vmem>>, vector<1x128xf32>
    %4 = vector.broadcast %3 : vector<1x128xf32> to vector<8x128xf32>
    %5 = arith.addf %2, %4 : vector<8x128xf32>
    %cst_5 = arith.constant 0.000000e+00 : f32
    %6 = vector.broadcast %cst_5 : f32 to vector<8x128xf32>
    %7 = arith.maximumf %5, %6 : vector<8x128xf32>
    %8 = arith.truncf %7 : vector<8x128xf32> to vector<8x128xbf16>
    %c0_6 = arith.constant 0 : index
    %c0_7 = arith.constant 0 : index
    %9 = vector.load %arg4[%c0_6, %c0_7] : memref<128x128xbf16, #tpu.memory_space<vmem>>, vector<128x128xbf16>
    %cst_8 = arith.constant dense<0.000000e+00> : vector<8x128xf32>
    %10 = tpu.matmul %8, %9, %cst_8 {dimension_numbers = #tpu.dot_dimension_numbers<[1], [0], [0], [1], [0, 0, 1, 1], [], []>} : vector<8x128xbf16>, vector<128x128xbf16>, vector<8x128xf32> -> vector<8x128xf32>
    %c0_9 = arith.constant 0 : index
    %c0_10 = arith.constant 0 : index
    %11 = vector.load %arg5[%c0_9, %c0_10] : memref<1x128xf32, #tpu.memory_space<vmem>>, vector<1x128xf32>
    %12 = vector.broadcast %11 : vector<1x128xf32> to vector<8x128xf32>
    %13 = arith.addf %10, %12 : vector<8x128xf32>
    %cst_11 = arith.constant 0.000000e+00 : f32
    %14 = vector.broadcast %cst_11 : f32 to vector<8x128xf32>
    %15 = arith.maximumf %13, %14 : vector<8x128xf32>
    %16 = arith.truncf %15 : vector<8x128xf32> to vector<8x128xbf16>
    %c0_12 = arith.constant 0 : index
    %c0_13 = arith.constant 0 : index
    %17 = vector.load %arg6[%c0_12, %c0_13] : memref<128x128xbf16, #tpu.memory_space<vmem>>, vector<128x128xbf16>
    %cst_14 = arith.constant dense<0.000000e+00> : vector<8x128xf32>
    %18 = tpu.matmul %16, %17, %cst_14 {dimension_numbers = #tpu.dot_dimension_numbers<[1], [0], [0], [1], [0, 0, 1, 1], [], []>} : vector<8x128xbf16>, vector<128x128xbf16>, vector<8x128xf32> -> vector<8x128xf32>
    %c0_15 = arith.constant 0 : index
    %c0_16 = arith.constant 0 : index
    %19 = vector.load %arg7[%c0_15, %c0_16] : memref<1x128xf32, #tpu.memory_space<vmem>>, vector<1x128xf32>
    %20 = vector.broadcast %19 : vector<1x128xf32> to vector<8x128xf32>
    %21 = arith.addf %18, %20 : vector<8x128xf32>
    %c0_17 = arith.constant 0 : index
    %c0_18 = arith.constant 0 : index
    %22 = vector.load %arg10[%c0_17, %c0_18] : memref<8x128xf32, #tpu.memory_space<vmem>>, vector<8x128xf32>
    tpu.vector_store %arg10[%c0_17, %c0_18], %21 {strides = array<i32>} : memref<8x128xf32, #tpu.memory_space<vmem>>, vector<8x128xf32>,
    %c0_19 = arith.constant 0 : index
    %c0_20 = arith.constant 0 : index
    %23 = vector.load %arg9[%c0_19, %c0_20] : memref<8x128xf32, #tpu.memory_space<vmem>>, vector<8x128xf32>
    %c0_21 = arith.constant 0 : index
    %c0_22 = arith.constant 0 : index
    %24 = vector.load %arg8[%c0_21, %c0_22] : memref<1x128xf32, #tpu.memory_space<vmem>>, vector<1x128xf32>
    %25 = vector.broadcast %24 : vector<1x128xf32> to vector<8x128xf32>
    %26 = arith.mulf %23, %25 : vector<8x128xf32>
    %27 = arith.addf %21, %26 : vector<8x128xf32>
    %c0_23 = arith.constant 0 : index
    %c0_24 = arith.constant 0 : index
    %28 = vector.load %arg11[%c0_23, %c0_24] : memref<8x128xf32, #tpu.memory_space<vmem>>, vector<8x128xf32>
    tpu.vector_store %arg11[%c0_23, %c0_24], %27 {strides = array<i32>} : memref<8x128xf32, #tpu.memory_space<vmem>>, vector<8x128xf32>,
    return
  }
  func.func @transform_0(%arg0: i32) -> (i32, i32) {
    %c0_i32 = arith.constant 0 : i32
    %c0_i32_0 = arith.constant 0 : i32
    return %arg0, %c0_i32 : i32, i32
  }
  func.func @transform_1(%arg0: i32) -> (i32, i32) {
    %c0_i32 = arith.constant 0 : i32
    %c0_i32_0 = arith.constant 0 : i32
    %c0_i32_1 = arith.constant 0 : i32
    return %c0_i32, %c0_i32_0 : i32, i32
  }
  func.func @transform_2(%arg0: i32) -> (i32, i32) {
    %c0_i32 = arith.constant 0 : i32
    %c0_i32_0 = arith.constant 0 : i32
    %c0_i32_1 = arith.constant 0 : i32
    return %c0_i32, %c0_i32_0 : i32, i32
  }
  func.func @transform_3(%arg0: i32) -> (i32, i32) {
    %c0_i32 = arith.constant 0 : i32
    %c0_i32_0 = arith.constant 0 : i32
    %c0_i32_1 = arith.constant 0 : i32
    return %c0_i32, %c0_i32_0 : i32, i32
  }
  func.func @transform_4(%arg0: i32) -> (i32, i32) {
    %c0_i32 = arith.constant 0 : i32
    %c0_i32_0 = arith.constant 0 : i32
    %c0_i32_1 = arith.constant 0 : i32
    return %c0_i32, %c0_i32_0 : i32, i32
  }
  func.func @transform_5(%arg0: i32) -> (i32, i32) {
    %c0_i32 = arith.constant 0 : i32
    %c0_i32_0 = arith.constant 0 : i32
    %c0_i32_1 = arith.constant 0 : i32
    return %c0_i32, %c0_i32_0 : i32, i32
  }
  func.func @transform_6(%arg0: i32) -> (i32, i32) {
    %c0_i32 = arith.constant 0 : i32
    %c0_i32_0 = arith.constant 0 : i32
    %c0_i32_1 = arith.constant 0 : i32
    return %c0_i32, %c0_i32_0 : i32, i32
  }
  func.func @transform_7(%arg0: i32) -> (i32, i32) {
    %c0_i32 = arith.constant 0 : i32
    %c0_i32_0 = arith.constant 0 : i32
    %c0_i32_1 = arith.constant 0 : i32
    return %c0_i32, %c0_i32_0 : i32, i32
  }
  func.func @transform_8(%arg0: i32) -> (i32, i32) {
    %c0_i32 = arith.constant 0 : i32
    %c0_i32_0 = arith.constant 0 : i32
    return %arg0, %c0_i32 : i32, i32
  }
  func.func @transform_9(%arg0: i32) -> (i32, i32) {
    %c0_i32 = arith.constant 0 : i32
    %c0_i32_0 = arith.constant 0 : i32
    return %arg0, %c0_i32 : i32, i32
  }
  func.func @transform_10(%arg0: i32) -> (i32, i32) {
    %c0_i32 = arith.constant 0 : i32
    %c0_i32_0 = arith.constant 0 : i32
    return %arg0, %c0_i32 : i32, i32
  }
}

</mosaic_0001>

<bundles_post_ra>
// kernel: _forward_impl.1
= control target key start
LH: loop header
LB: loop body
LE: loop exit
PB: predicated region body
PF: predicated region fallthrough
CT: control target
= control target key end

     0   :  { %16 = vsyncpa [#allocation3], 0  ;;  %s646_s0 = inlined_call_operand.vmem [shape: bf16[8,128], index: 0, kind: input, shape index: {}]   ;;  %s647_s1 = inlined_call_operand.hbm [shape: bf16[128,128], index: 1, kind: input, shape index: {}]   ;;  %s648_s2 = inlined_call_operand.vmem [shape: f32[1,128], index: 2, kind: input, shape index: {}]   ;;  %s649_s3 = inlined_call_operand.hbm [shape: bf16[128,128], index: 3, kind: input, shape index: {}]   ;;  %s650_s4 = inlined_call_operand.vmem [shape: f32[1,128], index: 4, kind: input, shape index: {}]   ;;  %s651_s5 = inlined_call_operand.hbm [shape: bf16[128,128], index: 5, kind: input, shape index: {}]   ;;  %s652_s6 = inlined_call_operand.vmem [shape: f32[1,128], index: 6, kind: input, shape index: {}]   ;;  %s653_s7 = inlined_call_operand.vmem [shape: f32[1,128], index: 7, kind: input, shape index: {}]   ;;  %s654_s8 = inlined_call_operand.vmem [shape: f32[8,128], index: 8, kind: input, shape index: {}]   ;;  %s655_s9 = inlined_call_operand.vmem [shape: f32[8,128], index: 9, kind: output, shape index: {0}]   ;;  %s656_s10 = inlined_call_operand.vmem [shape: f32[8,128], index: 10, kind: output, shape index: {1}]  }
   0x1   :  { %17 = vsyncpa [#allocation5], 0  ;;  %s39_s15 = sshll.u32 %s649_s3, 4  ;;  %s553_s16 = smov [#allocation4]   ;;  %s40_s15 = int_to_ptr.hbm [resolvable:$true] %s39_s15 }
   0x2   :  { %s41_s17 = sshll.u32 %s553_s16, 4  ;;  %s24_s20 = sshll.u32 %s647_s1, 4  ;;  %s42_s17 = int_to_ptr.vmem [resolvable:$true] %s41_s17  ;;  %s25_s20 = int_to_ptr.hbm [resolvable:$true] %s24_s20 }
   0x3   :  { %s554_s21 = smov 64   ;;  %s555_s22 = smov 4  }
   0x4   :  { %47 = dma.hbm_to_vmem [thread:$0]  %s40_s15, 1024, %s42_s17, [#allocation5], %s554_s21, %s554_s21, %s555_s22  }
   0x5   :  { %s556_s23 = smov [#allocation2]   ;;  %s54_s27 = sshll.u32 %s651_s5, 4  ;;  %s55_s27 = int_to_ptr.hbm [resolvable:$true] %s54_s27 }
   0x6   :  { %s26_s24 = sshll.u32 %s556_s23, 4  ;;  %s557_s3 = smov [#allocation6]   ;;  %s27_s24 = int_to_ptr.vmem [resolvable:$true] %s26_s24 }
   0x7   :  { %32 = dma.hbm_to_vmem [thread:$0]  %s25_s20, 1024, %s27_s24, [#allocation3], %s554_s21, %s554_s21, %s555_s22  }
   0x8   :  { %s56_s28 = sshll.u32 %s557_s3, 4  ;;  %s57_s28 = int_to_ptr.vmem [resolvable:$true] %s56_s28 }
   0x9   :  { %62 = dma.hbm_to_vmem [thread:$0]  %s55_s27, 1024, %s57_s28, [#allocation5], %s554_s21, %s554_s21, %s555_s22  }
   0xa   :  { %549 = dma.done.wait [#allocation3], 1024  }
   0xb   :  { %550 = vsyncadd [#allocation3], 4294966272 }
   0xc   :  { %551 = dma.done.wait [#allocation5], 2048  }
   0xd   :  { %552 = vsyncadd [#allocation5], 4294965248  ;;  %v451_v0 = vld [vmem:[#allocation2 + $0x38] sm:$0xff]  ;;  %v450_v1 = vld [vmem:[#allocation2 + $0x30] sm:$0xff] }
   0xe   :  { %150 = vmatpush.bf16.msra.mxu0 %v451_v0  ;;  %v459_v2 = vld [vmem:[#allocation4 + $0x38] sm:$0xff]  ;;  %v458_v3 = vld [vmem:[#allocation4 + $0x30] sm:$0xff]  ;;  %v449_v4 = vld [vmem:[#allocation2 + $0x28] sm:$0xff] }
   0xf   :  { %233 = vmatpush.bf16.msra.mxu1 %v459_v2  ;;  %v457_v5 = vld [vmem:[#allocation4 + $0x28] sm:$0xff]  ;;  %v448_v6 = vld [vmem:[#allocation2 + $0x20] sm:$0xff]  ;;  %v447_v8 = vld [vmem:[#allocation2 + $0x18] sm:$0xff] }
  0x10   :  { %v456_v7 = vld [vmem:[#allocation4 + $0x20] sm:$0xff]  ;;  %v455_v9 = vld [vmem:[#allocation4 + $0x18] sm:$0xff]  ;;  %v446_v10 = vld [vmem:[#allocation2 + $0x10] sm:$0xff] }
  0x11   :  { %v454_v11 = vld [vmem:[#allocation4 + $0x10] sm:$0xff]  ;;  %v445_v12 = vld [vmem:[#allocation2 + $0x8] sm:$0xff]  ;;  %v444_v13 = vld [vmem:[#allocation2] sm:$0xff] }
  0x12   :  { %151 = vmatpush.bf16.msra.mxu0 %v450_v1  ;;  %v81_v14 = vld [vmem:[%s646_s0] sm:$0xf]  ;;  %v453_v15 = vld [vmem:[#allocation4 + $0x8] sm:$0xff]  ;;  %v467_v17 = vld [vmem:[#allocation6 + $0x38] sm:$0xff] }
  0x13   :  { %234 = vmatpush.bf16.msra.mxu1 %v458_v3  ;;  %v452_v16 = vld [vmem:[#allocation4] sm:$0xff]  ;;  %316 = vmatpush.bf16.msra.mxu2 %v467_v17  ;;  %v466_v18 = vld [vmem:[#allocation6 + $0x30] sm:$0xff]  ;;  %v465_v19 = vld [vmem:[#allocation6 + $0x28] sm:$0xff] }
  0x14   :  { %v464_v20 = vld [vmem:[#allocation6 + $0x20] sm:$0xff]  ;;  %v463_v21 = vld [vmem:[#allocation6 + $0x18] sm:$0xff]  ;;  %v462_v22 = vld [vmem:[#allocation6 + $0x10] sm:$0xff] }
  0x15   :  { %v473_v23 = vld [vmem:[%s648_s2] ss:$0 sm:$0xff]  ;;  %v461_v29 = vld [vmem:[#allocation6 + $0x8] sm:$0xff] }
  0x16   :  { %152 = vmatpush.bf16.msra.mxu0 %v449_v4  ;;  %v460_v30 = vld [vmem:[#allocation6] sm:$0xff] }
  0x17   :  { %235 = vmatpush.bf16.msra.mxu1 %v457_v5  ;;  %317 = vmatpush.bf16.msra.mxu2 %v466_v18  ;;  %v474_v31 = vld [vmem:[%s650_s4] ss:$0 sm:$0xff] }
  0x18   :  { %v476_v37 = vld [vmem:[%s653_s7] ss:$0 sm:$0xff] }
  0x19   :  { %v330_v38 = vld [vmem:[%s654_s8] sm:$0xff] }
  0x1a   :  { %153 = vmatpush.bf16.msra.mxu0 %v448_v6  ;;  %v475_v39 = vld [vmem:[%s652_s6] ss:$0 sm:$0xff]  ;;  %v335_v40 = vmul.f32 %v476_v37, %v330_v38 }
  0x1b   :  { %236 = vmatpush.bf16.msra.mxu1 %v456_v7  ;;  %318 = vmatpush.bf16.msra.mxu2 %v465_v19 }
  0x1e   :  { %154 = vmatpush.bf16.msra.mxu0 %v447_v8 }
  0x1f   :  { %237 = vmatpush.bf16.msra.mxu1 %v455_v9  ;;  %319 = vmatpush.bf16.msra.mxu2 %v464_v20 }
  0x22   :  { %155 = vmatpush.bf16.msra.mxu0 %v446_v10 }
  0x23   :  { %238 = vmatpush.bf16.msra.mxu1 %v454_v11  ;;  %320 = vmatpush.bf16.msra.mxu2 %v463_v21 }
  0x26   :  { %156 = vmatpush.bf16.msra.mxu0 %v445_v12 }
  0x27   :  { %239 = vmatpush.bf16.msra.mxu1 %v453_v15  ;;  %321 = vmatpush.bf16.msra.mxu2 %v462_v22 }
  0x2a   :  { %157 = vmatpush.bf16.msra.mxu0 %v444_v13 }
  0x2b   :  { %240 = vmatpush.bf16.msra.mxu1 %v452_v16  ;;  %322 = vmatpush.bf16.msra.mxu2 %v461_v29 }
  0x2d   :  { %158 = vmatmul.bf16.vlgmr.msra.gmra.mxu0 %v81_v14 }
  0x2f   :  { %323 = vmatpush.bf16.msra.mxu2 %v460_v30 }
  0xaa   :  { %v159_v24 = vpop.f32.mrf.mxu0 }
  0xab   :  { %v160_v25 = vadd.f32 %v473_v23, %v159_v24 }
  0xad   :  { %v163_v26 = vmax.f32 %v160_v25, 0.0 }
  0xaf   :  { %v164_v27 = vpack.c.bf16 %v163_v26, %v163_v26 }
  0xb1   :  { %241 = vmatmul.bf16.vlgmr.msra.gmra.mxu1 %v164_v27 }
  0xb2   :  { %v161_v28 = vpop.f32.mrf.mxu0 }
 0x12e   :  { %v242_v32 = vpop.f32.mrf.mxu1 }
 0x12f   :  { %v243_v33 = vadd.f32 %v474_v31, %v242_v32 }
 0x131   :  { %v246_v34 = vmax.f32 %v243_v33, 0.0 }
 0x133   :  { %v247_v35 = vpack.c.bf16 %v246_v34, %v246_v34 }
 0x135   :  { %324 = vmatmul.bf16.vlgmr.msra.gmra.mxu2 %v247_v35 }
 0x136   :  { %v244_v36 = vpop.f32.mrf.mxu1 }
 0x1b8   :  { %v325_v41 = vpop.f32.mrf.mxu2 }
 0x1b9   :  { %v326_v42 = vadd.f32 %v475_v39, %v325_v41 }
 0x1bb   :  { %329 = vst [vmem:[%s655_s9] sm:$0xff] %v326_v42  ;;  %v336_v43 = vadd.f32 %v335_v40, %v326_v42 }
 0x1bd   :  { %337 = vst [vmem:[%s656_s10] sm:$0xff] %v336_v43 }
 0x1c0   :  { %v327_v44 = vpop.f32.mrf.mxu2 }
 0x1c1   :  { %346 = vsyncpa [#allocation3], 1 }
 0x1c2   :  { %347 = vsyncpa [#allocation5], 1 }

</bundles_post_ra>
